<compile_context>
chip_gen: v6e
topology: v6e:2x2x1
jax: 0.10.0
libtpu: 0.0.40
codegen_flags: <defaults>
</compile_context>

<pallas_src>
import numpy as np
import jax
import jax.numpy as jnp
from jax.experimental import pallas as pl
from jax.experimental.pallas import tpu as pltpu


def linear_pooling_2d_projector_hw(I, O):
    """Deterministic NumPy port of Linear_Pooling_2D_Projector_HW."""
    number_of_matrices, index = (1 + 2 * O + O ** 2, 0)
    projectors = np.zeros((number_of_matrices, O ** 2, I ** 2), dtype=np.uint8)
    for i in range(O):
        for j in range(O):
            projectors[index, i * O + j, (i * 2 + 1) * I + (j * 2 + 1)] = 1
    index += 1
    for i in range(O):
        for j in range(O):
            projectors[index, i * O + j, i * 2 * I + j * 2] = 1
            index += 1
    for i in range(O):
        for j in range(O):
            projectors[index, i * O + j, 2 * i * I + 2 * j + 1] = 1
        index += 1
    for j in range(O):
        for i in range(O):
            projectors[index, i * O + j, (2 * i + 1) * I + 2 * j] = 1
        index += 1
    linear_projector = np.zeros((O ** 2, I ** 2), dtype=np.uint8)
    for proj in projectors:
        linear_projector += proj
    return linear_projector


def _pool_matmul_kernel(p_ref, x_ref, o_ref):
    # p_ref: (O**2, I**2) f32 projector (constant index_map -> fetched once, VMEM
    #        resident; no per-step cast work).
    # x_ref: (I**2, TB) f32 batch tile, o_ref: (O**2, TB) f32 output tile.
    o_ref[...] = jnp.dot(p_ref[...], x_ref[...],
                         preferred_element_type=jnp.float32)


def _pick_batch_tile(B, max_tile):
    """Pick a lane tile: multiple of 128, as large as possible (amortize per-step
    overhead), but split into >= 2 tiles when the batch is big enough so the
    'parallel' axis can use both v7x TensorCores."""
    b128 = int(pl.cdiv(B, 128) * 128)
    tb = min(int(max_tile), b128)
    if b128 // tb < 2 and b128 >= 2 * 512:
        # Two roughly-equal tiles, each still >= 512 lanes.
        tb = int(pl.cdiv(pl.cdiv(b128, 2), 128) * 128)
    return tb


def linear_pooling_2d_state_vector(projector, input_state, *, batch_tile=4096):
    """out = Projector @ input_state.

    projector   : (O**2, I**2) float (0/1 values)
    input_state : (I**2, B) float32, batch on the trailing dim
    returns     : (O**2, B) float32
    """
    O2, I2 = projector.shape
    I2_x, B = input_state.shape
    assert I2_x == I2, "input_state leading dim must be I**2"

    # Keep the projector in f32: matmul math is bit-identical to the f32 reference
    # (its one-time HBM->VMEM cost is ~64 KB, noise) and the kernel does no casts.
    projector_f32 = projector.astype(jnp.float32)

    tb = _pick_batch_tile(B, batch_tile)
    grid = (int(pl.cdiv(B, tb)),)

    cost = pl.CostEstimate(
        flops=2 * O2 * I2 * B,
        transcendentals=0,
        bytes_accessed=O2 * I2 * 4 + I2 * B * 4 + O2 * B * 4,
    )

    # No padding / no output slicing: out_shape is exactly (O**2, B); Pallas masks
    # the (at most one) ragged tail tile, avoiding an extra HBM pass over x.
    return pl.pallas_call(
        _pool_matmul_kernel,
        out_shape=jax.ShapeDtypeStruct((O2, B), jnp.float32),
        grid_spec=pl.GridSpec(
            grid=grid,
            in_specs=[
                # Tiny projector: constant block index -> fetched once, VMEM-resident.
                pl.BlockSpec((O2, I2), lambda b: (0, 0)),
                # Only the state-vector batch is streamed / double-buffered.
                pl.BlockSpec((I2, tb), lambda b: (0, b)),
            ],
            out_specs=pl.BlockSpec((O2, tb), lambda b: (0, b)),
        ),
        compiler_params=pltpu.CompilerParams(
            dimension_semantics=("parallel",)),
        cost_estimate=cost,
    )(projector_f32, input_state)


if __name__ == "__main__":
    I, O = 16, 8          # input image 16x16 -> output image 8x8
    B = 384               # batch of state vectors (multiple of 128 -> zero padding)

    # Deterministic "parameter": the fixed 0/1 pooling projector.
    projector = jnp.asarray(
        linear_pooling_2d_projector_hw(I, O).astype(np.float32))   # (O**2, I**2)

    # Deterministic example input state: (I**2, B), batch along trailing dim.
    key = jax.random.PRNGKey(0)
    input_state = jax.random.normal(key, (I * I, B), dtype=jnp.float32)

    out = linear_pooling_2d_state_vector(projector, input_state)
    out = jax.block_until_ready(out)

    # Reference check (matches PyTorch forward semantics).
    ref = np.asarray(projector, np.float32) @ np.asarray(input_state, np.float32)
    assert out.shape == (O * O, B)
    np.testing.assert_allclose(np.asarray(out), ref, rtol=1e-6, atol=1e-6)

    print("KERNEL_OK")
</pallas_src>

<mosaic_0001>
module attributes {stable_mosaic.version = 11 : i64} {
  func.func @_pool_matmul_kernel(%arg0: i32, %arg1: memref<64x256xf32, #tpu.memory_space<vmem>>, %arg2: memref<256x384xf32, #tpu.memory_space<vmem>>, %arg3: memref<64x384xf32, #tpu.memory_space<vmem>>) attributes {dimension_semantics = [#tpu.dimension_semantics<parallel>], iteration_bounds = array<i64: 1>, scalar_prefetch = 0 : i64, scratch_operands = 0 : i64, tpu.core_type = #tpu.core_type<tc>, window_params = [{pipeline_mode = #tpu.pipeline_mode<synchronous>, transform_indices = @transform_0, window_bounds = array<i64: 64, 256>}, {transform_indices = @transform_1, window_bounds = array<i64: 256, 384>}, {transform_indices = @transform_2, window_bounds = array<i64: 64, 384>}]} {
    %c0 = arith.constant 0 : index
    %c0_0 = arith.constant 0 : index
    %0 = vector.load %arg1[%c0, %c0_0] : memref<64x256xf32, #tpu.memory_space<vmem>>, vector<64x256xf32>
    %c0_1 = arith.constant 0 : index
    %c0_2 = arith.constant 0 : index
    %1 = vector.load %arg2[%c0_1, %c0_2] : memref<256x384xf32, #tpu.memory_space<vmem>>, vector<256x384xf32>
    %cst = arith.constant dense<0.000000e+00> : vector<64x384xf32>
    %2 = tpu.matmul %0, %1, %cst {dimension_numbers = #tpu.dot_dimension_numbers<[1], [0], [0], [1], [0, 0, 1, 1], [], []>} : vector<64x256xf32>, vector<256x384xf32>, vector<64x384xf32> -> vector<64x384xf32>
    %c0_3 = arith.constant 0 : index
    %c0_4 = arith.constant 0 : index
    %3 = vector.load %arg3[%c0_3, %c0_4] : memref<64x384xf32, #tpu.memory_space<vmem>>, vector<64x384xf32>
    tpu.vector_store %arg3[%c0_3, %c0_4], %2 {strides = array<i32>} : memref<64x384xf32, #tpu.memory_space<vmem>>, vector<64x384xf32>,
    return
  }
  func.func @transform_0(%arg0: i32) -> (i32, i32) {
    %c0_i32 = arith.constant 0 : i32
    %c0_i32_0 = arith.constant 0 : i32
    %c0_i32_1 = arith.constant 0 : i32
    return %c0_i32, %c0_i32_0 : i32, i32
  }
  func.func @transform_1(%arg0: i32) -> (i32, i32) {
    %c0_i32 = arith.constant 0 : i32
    %c0_i32_0 = arith.constant 0 : i32
    return %c0_i32, %arg0 : i32, i32
  }
  func.func @transform_2(%arg0: i32) -> (i32, i32) {
    %c0_i32 = arith.constant 0 : i32
    %c0_i32_0 = arith.constant 0 : i32
    return %c0_i32, %arg0 : i32, i32
  }
}

</mosaic_0001>

<bundles_post_ra>
// kernel: tpu_custom_call.1
= control target key start
LH: loop header
LB: loop body
LE: loop exit
PB: predicated region body
PF: predicated region fallthrough
CT: control target
= control target key end

     0   :  { %7 = vsyncpa [#allocation3], 0  ;;  %s590_s0 = inlined_call_operand.hbm [shape: f32[64,256], index: 0, kind: input, shape index: {}]   ;;  %s591_s1 = inlined_call_operand.hbm [shape: f32[256,384], index: 1, kind: input, shape index: {}]   ;;  %s592_s2 = inlined_call_operand.hbm [shape: f32[64,384], index: 2, kind: output, shape index: {}]  }
   0x1   :  { %8 = vsyncpa [#allocation6], 0 }
   0x2   :  { %9 = vsyncpa [#allocation4], 0  ;;  %s541_s9 = smov [#allocation2]  }
   0x3   :  { %s15_s10 = sshll.u32 %s541_s9, 4  ;;  %s16_s10 = int_to_ptr.vmem [resolvable:$true] %s15_s10 }
   0x4   :  { %s483_s11 = scalar_lea.vmem %s16_s10, 2048  ;;  %p488_p1 = scmp.lt.s32.totalorder %s16_s10, %s16_s10 }
   0x5   :  { %p484_p0 = scmp.ne.s32.totalorder %s16_s10, %s483_s11  ;;  %p489_p2 = scmp.lt.s32.totalorder %s483_s11, %s483_s11 }
   0x7   :  { %p490_p3 = por %p489_p2, %p488_p1 }
   0x9   :  { %p491_p4 = pnand %p490_p3, %p484_p0 }
   0xb   :  { %494 = shalt.err (!%p491_p4)
}
   0xc   :  { %s542_s12 = smov 256   ;;  %s543_s13 = smov 16  }
   0xd   :  { %21 = dma.hbm_to_vmem [thread:$0]  %s590_s0, 2048, %s16_s10, [#allocation3], %s542_s12, %s542_s12, %s543_s13  }
   0xe   :  { %s544_s16 = smov [#allocation5]  }
   0xf   :  { %s27_s17 = sshll.u32 %s544_s16, 4  ;;  %s28_s17 = int_to_ptr.vmem [resolvable:$true] %s27_s17 }
  0x10   :  { %s503_s18 = scalar_lea.vmem %s28_s17, 12288  ;;  %p508_p6 = scmp.lt.s32.totalorder %s28_s17, %s28_s17 }
  0x11   :  { %p504_p5 = scmp.ne.s32.totalorder %s28_s17, %s503_s18  ;;  %p509_p7 = scmp.lt.s32.totalorder %s503_s18, %s503_s18 }
  0x13   :  { %p510_p8 = por %p509_p7, %p508_p6 }
  0x15   :  { %p511_p9 = pnand %p510_p8, %p504_p5 }
  0x17   :  { %514 = shalt.err (!%p511_p9)
}
  0x18   :  { %s545_s19 = smov 384   ;;  %s546_s20 = smov 24  }
  0x19   :  { %33 = dma.hbm_to_vmem [thread:$0]  %s591_s1, 12288, %s28_s17, [#allocation6], %s545_s19, %s545_s19, %s546_s20  }
  0x1a   :  { %535 = dma.done.wait [#allocation3], 2048  }
  0x1b   :  { %536 = vsyncadd [#allocation3], 4294965248 }
  0x1c   :  { %537 = dma.done.wait [#allocation6], 12288  }
  0x1d   :  { %538 = vsyncadd [#allocation6], 4294955008  ;;  %v102_v0 = vld [vmem:[#allocation5 + $0x170] sm:$0xff]  ;;  %v101_v1 = vld [vmem:[#allocation5 + $0x168] sm:$0xff]  ;;  %s547_s0 = smov [#allocation7]  }
  0x1e   :  { %v99_v2 = vld [vmem:[#allocation5 + $0x158] sm:$0xff]  ;;  %152 = vmatprep.subr.mxu0 %v102_v0  ;;  %v98_v3 = vld [vmem:[#allocation5 + $0x150] sm:$0xff]  ;;  %v96_v4 = vld [vmem:[#allocation5 + $0x140] sm:$0xff]  ;;  %s399_s1 = sshll.u32 %s547_s0, 4  ;;  %s400_s1 = int_to_ptr.vmem [resolvable:$true] %s399_s1 }
  0x1f   :  { %153 = vmatpush1.msra.mxu0 %v101_v1  ;;  %v95_v5 = vld [vmem:[#allocation5 + $0x138] sm:$0xff]  ;;  %v93_v6 = vld [vmem:[#allocation5 + $0x128] sm:$0xff]  ;;  %v92_v7 = vld [vmem:[#allocation5 + $0x120] sm:$0xff]  ;;  %s515_s23 = scalar_lea.vmem %s400_s1, 3072  ;;  %p520_p11 = scmp.lt.s32.totalorder %s400_s1, %s400_s1 }
  0x20   :  { %154 = vmatprep.subr.mxu0 %v99_v2  ;;  %v90_v8 = vld [vmem:[#allocation5 + $0x110] sm:$0xff]  ;;  %v89_v9 = vld [vmem:[#allocation5 + $0x108] sm:$0xff]  ;;  %v87_v10 = vld [vmem:[#allocation5 + $0xf8] sm:$0xff]  ;;  %p516_p10 = scmp.ne.s32.totalorder %s400_s1, %s515_s23  ;;  %p521_p12 = scmp.lt.s32.totalorder %s515_s23, %s515_s23 }
  0x21   :  { %155 = vmatpush1.msra.mxu0 %v98_v3  ;;  %v86_v11 = vld [vmem:[#allocation5 + $0xf0] sm:$0xff]  ;;  %v151_v12 = vld [vmem:[#allocation5 + $0x2f8] sm:$0xff]  ;;  %v84_v13 = vld [vmem:[#allocation5 + $0xe0] sm:$0xff] }
  0x22   :  { %156 = vmatprep.subr.mxu0 %v96_v4  ;;  %412 = vmatprep.subr.mxu1 %v151_v12  ;;  %v103_v14 = vld [vmem:[#allocation5 + $0x178] sm:$0xff]  ;;  %v148_v16 = vld [vmem:[#allocation5 + $0x2e0] sm:$0xff]  ;;  %v81_v18 = vld [vmem:[#allocation5 + $0xc8] sm:$0xff]  ;;  %p522_p13 = por %p521_p12, %p520_p11 }
  0x23   :  { %157 = vmatpush1.msra.mxu0 %v95_v5  ;;  %v83_v15 = vld [vmem:[#allocation5 + $0xd8] sm:$0xff]  ;;  %413 = vmatpush3.msra.mxu1 %v103_v14  ;;  %v100_v17 = vld [vmem:[#allocation5 + $0x160] sm:$0xff]  ;;  %v145_v19 = vld [vmem:[#allocation5 + $0x2c8] sm:$0xff] }
  0x24   :  { %158 = vmatprep.subr.mxu0 %v93_v6  ;;  %414 = vmatprep.subr.mxu1 %v148_v16  ;;  %v80_v20 = vld [vmem:[#allocation5 + $0xc0] sm:$0xff]  ;;  %v97_v21 = vld [vmem:[#allocation5 + $0x148] sm:$0xff]  ;;  %v142_v22 = vld [vmem:[#allocation5 + $0x2b0] sm:$0xff]  ;;  %p523_p0 = pnand %p522_p13, %p516_p10 }
  0x25   :  { %159 = vmatpush1.msra.mxu0 %v92_v7  ;;  %415 = vmatpush3.msra.mxu1 %v100_v17  ;;  %v78_v23 = vld [vmem:[#allocation5 + $0xb0] sm:$0xff]  ;;  %v77_v25 = vld [vmem:[#allocation5 + $0xa8] sm:$0xff]  ;;  %v139_v26 = vld [vmem:[#allocation5 + $0x298] sm:$0xff] }
  0x26   :  { %160 = vmatprep.subr.mxu0 %v90_v8  ;;  %416 = vmatprep.subr.mxu1 %v145_v19  ;;  %v94_v24 = vld [vmem:[#allocation5 + $0x130] sm:$0xff]  ;;  %v75_v27 = vld [vmem:[#allocation5 + $0x98] sm:$0xff]  ;;  %v136_v30 = vld [vmem:[#allocation5 + $0x280] sm:$0xff] }
  0x27   :  { %161 = vmatpush1.msra.mxu0 %v89_v9  ;;  %417 = vmatpush3.msra.mxu1 %v97_v21  ;;  %v91_v28 = vld [vmem:[#allocation5 + $0x118] sm:$0xff]  ;;  %v74_v29 = vld [vmem:[#allocation5 + $0x90] sm:$0xff]  ;;  %v72_v31 = vld [vmem:[#allocation5 + $0x80] sm:$0xff] }
  0x28   :  { %162 = vmatprep.subr.mxu0 %v87_v10  ;;  %418 = vmatprep.subr.mxu1 %v142_v22  ;;  %v88_v32 = vld [vmem:[#allocation5 + $0x100] sm:$0xff]  ;;  %v71_v33 = vld [vmem:[#allocation5 + $0x78] sm:$0xff]  ;;  %v133_v34 = vld [vmem:[#allocation5 + $0x268] sm:$0xff] }
  0x29   :  { %163 = vmatpush1.msra.mxu0 %v86_v11  ;;  %419 = vmatpush3.msra.mxu1 %v94_v24  ;;  %v69_v35 = vld [vmem:[#allocation5 + $0x68] sm:$0xff]  ;;  %v68_v37 = vld [vmem:[#allocation5 + $0x60] sm:$0xff]  ;;  %v130_v38 = vld [vmem:[#allocation5 + $0x250] sm:$0xff] }
  0x2a   :  { %164 = vmatprep.subr.mxu0 %v84_v13  ;;  %420 = vmatprep.subr.mxu1 %v139_v26  ;;  %v85_v36 = vld [vmem:[#allocation5 + $0xe8] sm:$0xff]  ;;  %v66_v39 = vld [vmem:[#allocation5 + $0x50] sm:$0xff]  ;;  %v127_v42 = vld [vmem:[#allocation5 + $0x238] sm:$0xff] }
  0x2b   :  { %165 = vmatpush1.msra.mxu0 %v83_v15  ;;  %421 = vmatpush3.msra.mxu1 %v91_v28  ;;  %v82_v40 = vld [vmem:[#allocation5 + $0xd0] sm:$0xff]  ;;  %v65_v41 = vld [vmem:[#allocation5 + $0x48] sm:$0xff]  ;;  %v63_v43 = vld [vmem:[#allocation5 + $0x38] sm:$0xff] }
  0x2c   :  { %166 = vmatprep.subr.mxu0 %v81_v18  ;;  %422 = vmatprep.subr.mxu1 %v136_v30  ;;  %v79_v44 = vld [vmem:[#allocation5 + $0xb8] sm:$0xff]  ;;  %v62_v45 = vld [vmem:[#allocation5 + $0x30] sm:$0xff]  ;;  %v124_v46 = vld [vmem:[#allocation5 + $0x220] sm:$0xff] }
  0x2d   :  { %167 = vmatpush1.msra.mxu0 %v80_v20  ;;  %423 = vmatpush3.msra.mxu1 %v88_v32  ;;  %v60_v47 = vld [vmem:[#allocation5 + $0x20] sm:$0xff]  ;;  %v59_v49 = vld [vmem:[#allocation5 + $0x18] sm:$0xff]  ;;  %v121_v50 = vld [vmem:[#allocation5 + $0x208] sm:$0xff] }
  0x2e   :  { %168 = vmatprep.subr.mxu0 %v78_v23  ;;  %424 = vmatprep.subr.mxu1 %v133_v34  ;;  %v76_v48 = vld [vmem:[#allocation5 + $0xa0] sm:$0xff]  ;;  %v57_v51 = vld [vmem:[#allocation5 + $0x8] sm:$0xff]  ;;  %v118_v54 = vld [vmem:[#allocation5 + $0x1f0] sm:$0xff] }
  0x2f   :  { %169 = vmatpush1.msra.mxu0 %v77_v25  ;;  %425 = vmatpush3.msra.mxu1 %v85_v36  ;;  %v73_v52 = vld [vmem:[#allocation5 + $0x88] sm:$0xff]  ;;  %v56_v53 = vld [vmem:[#allocation5] sm:$0xff]  ;;  %v150_v55 = vld [vmem:[#allocation5 + $0x2f0] sm:$0xff] }
  0x30   :  { %170 = vmatprep.subr.mxu0 %v75_v27  ;;  %426 = vmatprep.subr.mxu1 %v130_v38  ;;  %v70_v56 = vld [vmem:[#allocation5 + $0x70] sm:$0xff]  ;;  %v149_v57 = vld [vmem:[#allocation5 + $0x2e8] sm:$0xff]  ;;  %v115_v58 = vld [vmem:[#allocation5 + $0x1d8] sm:$0xff] }
  0x31   :  { %171 = vmatpush1.msra.mxu0 %v74_v29  ;;  %427 = vmatpush3.msra.mxu1 %v82_v40  ;;  %v147_v59 = vld [vmem:[#allocation5 + $0x2d8] sm:$0xff]  ;;  %v146_v61 = vld [vmem:[#allocation5 + $0x2d0] sm:$0xff]  ;;  %v112_v62 = vld [vmem:[#allocation5 + $0x1c0] sm:$0xff] }
  0x32   :  { %172 = vmatprep.subr.mxu0 %v72_v31  ;;  %428 = vmatprep.subr.mxu1 %v127_v42  ;;  %v67_v60 = vld [vmem:[#allocation5 + $0x58] sm:$0xff]  ;;  %v144_v63 = vld [vmem:[#allocation5 + $0x2c0] sm:$0xff]  ;;  %v109_v2 = vld [vmem:[#allocation5 + $0x1a8] sm:$0xff] }
  0x33   :  { %173 = vmatpush1.msra.mxu0 %v71_v33  ;;  %429 = vmatpush3.msra.mxu1 %v79_v44  ;;  %v64_v0 = vld [vmem:[#allocation5 + $0x40] sm:$0xff]  ;;  %v143_v1 = vld [vmem:[#allocation5 + $0x2b8] sm:$0xff]  ;;  %v141_v3 = vld [vmem:[#allocation5 + $0x2a8] sm:$0xff] }
  0x34   :  { %174 = vmatprep.subr.mxu0 %v69_v35  ;;  %430 = vmatprep.subr.mxu1 %v124_v46  ;;  %v61_v4 = vld [vmem:[#allocation5 + $0x28] sm:$0xff]  ;;  %v140_v5 = vld [vmem:[#allocation5 + $0x2a0] sm:$0xff]  ;;  %v106_v6 = vld [vmem:[#allocation5 + $0x190] sm:$0xff] }
  0x35   :  { %175 = vmatpush1.msra.mxu0 %v68_v37  ;;  %431 = vmatpush3.msra.mxu1 %v76_v48  ;;  %v138_v7 = vld [vmem:[#allocation5 + $0x290] sm:$0xff]  ;;  %v137_v9 = vld [vmem:[#allocation5 + $0x288] sm:$0xff]  ;;  %v135_v11 = vld [vmem:[#allocation5 + $0x278] sm:$0xff] }
  0x36   :  { %176 = vmatprep.subr.mxu0 %v66_v39  ;;  %432 = vmatprep.subr.mxu1 %v121_v50  ;;  %v58_v8 = vld [vmem:[#allocation5 + $0x10] sm:$0xff]  ;;  %v41_v10 = vld [vmem:[#allocation2 + $0x8] sm:$0xff]  ;;  %v572_v12 = vld [vmem:[#allocation2] sm:$0xff] }
  0x37   :  { %177 = vmatpush1.msra.mxu0 %v65_v41  ;;  %433 = vmatpush3.msra.mxu1 %v73_v52  ;;  %v134_v13 = vld [vmem:[#allocation5 + $0x270] sm:$0xff]  ;;  %v132_v14 = vld [vmem:[#allocation5 + $0x260] sm:$0xff]  ;;  %v574_v15 = vld [vmem:[#allocation2 + $0x18] sm:$0xff] }
  0x38   :  { %178 = vmatprep.subr.mxu0 %v63_v43  ;;  %434 = vmatprep.subr.mxu1 %v118_v54  ;;  %v131_v16 = vld [vmem:[#allocation5 + $0x258] sm:$0xff]  ;;  %v129_v17 = vld [vmem:[#allocation5 + $0x248] sm:$0xff]  ;;  %v577_v18 = vld [vmem:[#allocation2 + $0x10] sm:$0xff] }
  0x39   :  { %179 = vmatpush1.msra.mxu0 %v62_v45  ;;  %435 = vmatpush3.msra.mxu1 %v70_v56  ;;  %v128_v19 = vld [vmem:[#allocation5 + $0x240] sm:$0xff]  ;;  %v45_v20 = vld [vmem:[#allocation2 + $0x28] sm:$0xff]  ;;  %v126_v21 = vld [vmem:[#allocation5 + $0x230] sm:$0xff] }
  0x3a   :  { %180 = vmatprep.subr.mxu0 %v60_v47  ;;  %436 = vmatprep.subr.mxu1 %v115_v58  ;;  %v125_v22 = vld [vmem:[#allocation5 + $0x228] sm:$0xff]  ;;  %v123_v23 = vld [vmem:[#allocation5 + $0x218] sm:$0xff]  ;;  %v44_v24 = vld [vmem:[#allocation2 + $0x20] sm:$0xff] }
  0x3b   :  { %181 = vmatpush1.msra.mxu0 %v59_v49  ;;  %437 = vmatpush3.msra.mxu1 %v67_v60  ;;  %v122_v25 = vld [vmem:[#allocation5 + $0x210] sm:$0xff]  ;;  %v47_v26 = vld [vmem:[#allocation2 + $0x38] sm:$0xff]  ;;  %v120_v27 = vld [vmem:[#allocation5 + $0x200] sm:$0xff] }
  0x3c   :  { %182 = vmatprep.subr.mxu0 %v57_v51  ;;  %438 = vmatprep.subr.mxu1 %v112_v62  ;;  %v119_v28 = vld [vmem:[#allocation5 + $0x1f8] sm:$0xff]  ;;  %v117_v29 = vld [vmem:[#allocation5 + $0x1e8] sm:$0xff]  ;;  %v46_v30 = vld [vmem:[#allocation2 + $0x30] sm:$0xff] }
  0x3d   :  { %183 = vmatpush1.msra.mxu0 %v56_v53  ;;  %439 = vmatpush3.msra.mxu1 %v64_v0  ;;  %v116_v31 = vld [vmem:[#allocation5 + $0x1e0] sm:$0xff]  ;;  %v49_v32 = vld [vmem:[#allocation2 + $0x48] sm:$0xff]  ;;  %v114_v33 = vld [vmem:[#allocation5 + $0x1d0] sm:$0xff] }
  0x3e   :  { %184 = vmatprep.subr.mxu0 %v150_v55  ;;  %440 = vmatprep.subr.mxu1 %v109_v2  ;;  %v113_v34 = vld [vmem:[#allocation5 + $0x1c8] sm:$0xff]  ;;  %v111_v35 = vld [vmem:[#allocation5 + $0x1b8] sm:$0xff]  ;;  %v48_v36 = vld [vmem:[#allocation2 + $0x40] sm:$0xff] }
  0x3f   :  { %185 = vmatpush2.msra.mxu0 %v149_v57  ;;  %441 = vmatpush3.msra.mxu1 %v61_v4  ;;  %v110_v37 = vld [vmem:[#allocation5 + $0x1b0] sm:$0xff]  ;;  %v51_v38 = vld [vmem:[#allocation2 + $0x58] sm:$0xff]  ;;  %v108_v39 = vld [vmem:[#allocation5 + $0x1a0] sm:$0xff] }
  0x40   :  { %186 = vmatprep.subr.mxu0 %v147_v59  ;;  %442 = vmatprep.subr.mxu1 %v106_v6  ;;  %v107_v40 = vld [vmem:[#allocation5 + $0x198] sm:$0xff]  ;;  %v105_v41 = vld [vmem:[#allocation5 + $0x188] sm:$0xff]  ;;  %v50_v42 = vld [vmem:[#allocation2 + $0x50] sm:$0xff] }
  0x41   :  { %187 = vmatpush2.msra.mxu0 %v146_v61  ;;  %443 = vmatpush3.msra.mxu1 %v58_v8  ;;  %v104_v43 = vld [vmem:[#allocation5 + $0x180] sm:$0xff]  ;;  %v53_v44 = vld [vmem:[#allocation2 + $0x68] sm:$0xff]  ;;  %v55_v46 = vld [vmem:[#allocation2 + $0x78] sm:$0xff] }
  0x42   :  { %188 = vmatprep.subr.mxu0 %v144_v63  ;;  %329 = vmatprep.mubr.f32.mxu1 %v41_v10  ;;  %v52_v45 = vld [vmem:[#allocation2 + $0x60] sm:$0xff]  ;;  %v54_v47 = vld [vmem:[#allocation2 + $0x70] sm:$0xff] }
  0x43   :  { %189 = vmatpush2.msra.mxu0 %v143_v1  ;;  %330 = vmatmul.mubr.f32.vlgmr.msra.gmra.mxu1 %v572_v12 }
  0x44   :  { %190 = vmatprep.subr.mxu0 %v141_v3  ;;  %216 = vmatprep.mubr.f32.mxu0 %v41_v10 }
  0x45   :  { %191 = vmatpush2.msra.mxu0 %v140_v5  ;;  %334 = vmatprep.mubr.f32.mxu1 %v574_v15 }
  0x46   :  { %192 = vmatprep.subr.mxu0 %v138_v7 }
  0x47   :  { %193 = vmatpush2.msra.mxu0 %v137_v9  ;;  %335 = vmatmul.mubr.f32.gmra.mxu1 %v577_v18 }
  0x48   :  { %194 = vmatprep.subr.mxu0 %v135_v11  ;;  %339 = vmatprep.mubr.f32.mxu1 %v45_v20 }
  0x49   :  { %195 = vmatpush2.msra.mxu0 %v134_v13 }
  0x4a   :  { %196 = vmatprep.subr.mxu0 %v132_v14 }
  0x4b   :  { %197 = vmatpush2.msra.mxu0 %v131_v16  ;;  %340 = vmatmul.mubr.f32.gmra.mxu1 %v44_v24 }
  0x4c   :  { %198 = vmatprep.subr.mxu0 %v129_v17  ;;  %344 = vmatprep.mubr.f32.mxu1 %v47_v26 }
  0x4d   :  { %199 = vmatpush2.msra.mxu0 %v128_v19 }
  0x4e   :  { %200 = vmatprep.subr.mxu0 %v126_v21 }
  0x4f   :  { %201 = vmatpush2.msra.mxu0 %v125_v22  ;;  %345 = vmatmul.mubr.f32.gmra.mxu1 %v46_v30 }
  0x50   :  { %202 = vmatprep.subr.mxu0 %v123_v23  ;;  %349 = vmatprep.mubr.f32.mxu1 %v49_v32 }
  0x51   :  { %203 = vmatpush2.msra.mxu0 %v122_v25 }
  0x52   :  { %204 = vmatprep.subr.mxu0 %v120_v27 }
  0x53   :  { %205 = vmatpush2.msra.mxu0 %v119_v28  ;;  %350 = vmatmul.mubr.f32.gmra.mxu1 %v48_v36 }
  0x54   :  { %206 = vmatprep.subr.mxu0 %v117_v29  ;;  %354 = vmatprep.mubr.f32.mxu1 %v51_v38 }
  0x55   :  { %207 = vmatpush2.msra.mxu0 %v116_v31 }
  0x56   :  { %208 = vmatprep.subr.mxu0 %v114_v33 }
  0x57   :  { %209 = vmatpush2.msra.mxu0 %v113_v34  ;;  %355 = vmatmul.mubr.f32.gmra.mxu1 %v50_v42 }
  0x58   :  { %210 = vmatprep.subr.mxu0 %v111_v35  ;;  %359 = vmatprep.mubr.f32.mxu1 %v53_v44 }
  0x59   :  { %211 = vmatpush2.msra.mxu0 %v110_v37 }
  0x5a   :  { %212 = vmatprep.subr.mxu0 %v108_v39 }
  0x5b   :  { %213 = vmatpush2.msra.mxu0 %v107_v40  ;;  %360 = vmatmul.mubr.f32.gmra.mxu1 %v52_v45 }
  0x5c   :  { %214 = vmatprep.subr.mxu0 %v105_v41  ;;  %364 = vmatprep.mubr.f32.mxu1 %v55_v46 }
  0x5d   :  { %215 = vmatpush2.msra.mxu0 %v104_v43 }
  0x5e   :  { %217 = vmatmul.mubr.f32.vlgmr.msra.gmra.mxu0 %v572_v12 }
  0x5f   :  { %222 = vmatprep.mubr.f32.mxu0 %v574_v15  ;;  %365 = vmatmul.mubr.f32.gmra.mxu1 %v54_v47 }
  0x62   :  { %223 = vmatmul.mubr.f32.gmra.mxu0 %v577_v18 }
  0x63   :  { %228 = vmatprep.mubr.f32.mxu0 %v45_v20 }
  0x66   :  { %229 = vmatmul.mubr.f32.gmra.mxu0 %v44_v24 }
  0x67   :  { %234 = vmatprep.mubr.f32.mxu0 %v47_v26 }
  0x6a   :  { %235 = vmatmul.mubr.f32.gmra.mxu0 %v46_v30 }
  0x6b   :  { %240 = vmatprep.mubr.f32.mxu0 %v49_v32 }
  0x6e   :  { %241 = vmatmul.mubr.f32.gmra.mxu0 %v48_v36 }
  0x6f   :  { %246 = vmatprep.mubr.f32.mxu0 %v51_v38 }
  0x72   :  { %247 = vmatmul.mubr.f32.gmra.mxu0 %v50_v42 }
  0x73   :  { %252 = vmatprep.mubr.f32.mxu0 %v53_v44 }
  0x76   :  { %253 = vmatmul.mubr.f32.gmra.mxu0 %v52_v45 }
  0x77   :  { %258 = vmatprep.mubr.f32.mxu0 %v55_v46 }
  0x7a   :  { %259 = vmatmul.mubr.f32.gmra.mxu0 %v54_v47 }
 0x103   :  { %v444_v48 = vpop.f32.mrf.mxu1 }
 0x105   :  { %v445_v49 = vpop.f32.mrf.mxu1 }
 0x106   :  { %v446_v50 = vadd.f32 %v445_v49, %v444_v48 }
 0x107   :  { %v447_v51 = vpop.f32.mrf.mxu1 }
 0x108   :  { %372 = vst [vmem:[#allocation7 + $0x10] sm:$0xff] %v446_v50 }
 0x109   :  { %v448_v52 = vpop.f32.mrf.mxu1 }
 0x10a   :  { %v449_v53 = vadd.f32 %v448_v52, %v447_v51 }
 0x10b   :  { %v450_v54 = vpop.f32.mrf.mxu1 }
 0x10c   :  { %375 = vst [vmem:[#allocation7 + $0x28] sm:$0xff] %v449_v53 }
 0x10d   :  { %v451_v55 = vpop.f32.mrf.mxu1 }
 0x10e   :  { %v452_v56 = vadd.f32 %v451_v55, %v450_v54 }
 0x10f   :  { %v453_v57 = vpop.f32.mrf.mxu1 }
 0x110   :  { %378 = vst [vmem:[#allocation7 + $0x40] sm:$0xff] %v452_v56 }
 0x111   :  { %v454_v58 = vpop.f32.mrf.mxu1 }
 0x112   :  { %v455_v59 = vadd.f32 %v454_v58, %v453_v57 }
 0x113   :  { %v456_v60 = vpop.f32.mrf.mxu1 }
 0x114   :  { %381 = vst [vmem:[#allocation7 + $0x58] sm:$0xff] %v455_v59 }
 0x115   :  { %v457_v61 = vpop.f32.mrf.mxu1 }
 0x116   :  { %v458_v62 = vadd.f32 %v457_v61, %v456_v60 }
 0x117   :  { %v459_v63 = vpop.f32.mrf.mxu1 }
 0x118   :  { %384 = vst [vmem:[#allocation7 + $0x70] sm:$0xff] %v458_v62 }
 0x119   :  { %v460_v1 = vpop.f32.mrf.mxu1 }
 0x11a   :  { %v461_v2 = vadd.f32 %v460_v1, %v459_v63 }
 0x11b   :  { %v462_v4 = vpop.f32.mrf.mxu1 }
 0x11c   :  { %387 = vst [vmem:[#allocation7 + $0x88] sm:$0xff] %v461_v2 }
 0x11d   :  { %v463_v6 = vpop.f32.mrf.mxu1 }
 0x11e   :  { %v218_v0 = vpop.f32.mrf.mxu0  ;;  %v464_v7 = vadd.f32 %v463_v6, %v462_v4 }
 0x11f   :  { %370 = vst [vmem:[#allocation7] sm:$0xff] %v218_v0  ;;  %v465_v9 = vpop.f32.mrf.mxu1 }
 0x120   :  { %v220_v3 = vpop.f32.mrf.mxu0  ;;  %390 = vst [vmem:[#allocation7 + $0xa0] sm:$0xff] %v464_v7 }
 0x121   :  { %371 = vst [vmem:[#allocation7 + $0x8] sm:$0xff] %v220_v3  ;;  %v466_v11 = vpop.f32.mrf.mxu1 }
 0x122   :  { %v224_v5 = vpop.f32.mrf.mxu0  ;;  %v467_v12 = vadd.f32 %v466_v11, %v465_v9 }
 0x123   :  { %373 = vst [vmem:[#allocation7 + $0x18] sm:$0xff] %v224_v5 }
 0x124   :  { %v226_v8 = vpop.f32.mrf.mxu0  ;;  %393 = vst [vmem:[#allocation7 + $0xb8] sm:$0xff] %v467_v12 }
 0x125   :  { %374 = vst [vmem:[#allocation7 + $0x20] sm:$0xff] %v226_v8 }
 0x126   :  { %v230_v10 = vpop.f32.mrf.mxu0 }
 0x127   :  { %376 = vst [vmem:[#allocation7 + $0x30] sm:$0xff] %v230_v10 }
 0x128   :  { %v232_v13 = vpop.f32.mrf.mxu0 }
 0x129   :  { %377 = vst [vmem:[#allocation7 + $0x38] sm:$0xff] %v232_v13 }
 0x12a   :  { %v236_v14 = vpop.f32.mrf.mxu0 }
 0x12b   :  { %379 = vst [vmem:[#allocation7 + $0x48] sm:$0xff] %v236_v14 }
 0x12c   :  { %v238_v15 = vpop.f32.mrf.mxu0 }
 0x12d   :  { %380 = vst [vmem:[#allocation7 + $0x50] sm:$0xff] %v238_v15 }
 0x12e   :  { %v242_v16 = vpop.f32.mrf.mxu0 }
 0x12f   :  { %382 = vst [vmem:[#allocation7 + $0x60] sm:$0xff] %v242_v16 }
 0x130   :  { %v244_v17 = vpop.f32.mrf.mxu0 }
 0x131   :  { %383 = vst [vmem:[#allocation7 + $0x68] sm:$0xff] %v244_v17 }
 0x132   :  { %v248_v18 = vpop.f32.mrf.mxu0 }
 0x133   :  { %385 = vst [vmem:[#allocation7 + $0x78] sm:$0xff] %v248_v18 }
 0x134   :  { %v250_v19 = vpop.f32.mrf.mxu0 }
 0x135   :  { %386 = vst [vmem:[#allocation7 + $0x80] sm:$0xff] %v250_v19 }
 0x136   :  { %v254_v20 = vpop.f32.mrf.mxu0 }
 0x137   :  { %388 = vst [vmem:[#allocation7 + $0x90] sm:$0xff] %v254_v20 }
 0x138   :  { %v256_v21 = vpop.f32.mrf.mxu0 }
 0x139   :  { %389 = vst [vmem:[#allocation7 + $0x98] sm:$0xff] %v256_v21 }
 0x13a   :  { %v260_v22 = vpop.f32.mrf.mxu0 }
 0x13b   :  { %391 = vst [vmem:[#allocation7 + $0xa8] sm:$0xff] %v260_v22 }
 0x13c   :  { %v262_v23 = vpop.f32.mrf.mxu0 }
 0x13d   :  { %392 = vst [vmem:[#allocation7 + $0xb0] sm:$0xff] %v262_v23 }
 0x13e   :  { %526 = shalt.err (!%p523_p0)
}
 0x13f   :  { %405 = dma.vmem_to_hbm [thread:$0]  %s400_s1, 3072, %s592_s2, [#allocation4], %s545_s19, %s545_s19, %s546_s20  }
 0x140   :  { %539 = dma.done.wait [#allocation4], 3072  }
 0x141   :  { %540 = vsyncadd [#allocation4], 4294964224 }
 0x142   :  { %409 = vsyncpa [#allocation3], 1 }
 0x143   :  { %410 = vsyncpa [#allocation6], 1 }
 0x144   :  { %411 = vsyncpa [#allocation4], 1 }

</bundles_post_ra>
